<compile_context>
chip_gen: v5e
topology: v5e:2x2
jax: 0.10.0
libtpu: 0.0.40
codegen_flags: <defaults>
</compile_context>

<pallas_src>
import math
import jax
import jax.numpy as jnp
from jax.experimental import pallas as pl
from jax.experimental.pallas import tpu as pltpu


def network_block_kernel(
    x_ref,                       # [Bt, S, E] f32
    ln1_g_ref, ln1_b_ref,        # [1, E] f32
    wq_ref, wk_ref, wv_ref,      # [E, E] bf16 each
    bq_ref, bk_ref, bv_ref,      # [1, E] f32 each
    wbp_ref, bbp_ref,            # [E, E] bf16, [1, E] f32
    ln2_g_ref, ln2_b_ref,        # [1, E] f32
    w1_ref, b1_ref,              # [E, 4E] bf16, [1, 4E] f32
    w2_ref, b2_ref,              # [4E, E] bf16, [1, E] f32
    o_ref,                       # [Bt, S, E] f32
):
    eps = 1e-5
    bf16 = jnp.bfloat16
    x3 = x_ref[...]                                   # [Bt, S, E] f32
    Bt, S, E = x3.shape
    M = Bt * S
    x = x3.reshape(M, E)                              # fold batch into matmul M dim

    # ---- LayerNorm 1 (f32, single-pass variance) ----
    mu = jnp.mean(x, axis=-1, keepdims=True)
    var = jnp.mean(x * x, axis=-1, keepdims=True) - mu * mu
    h = (x - mu) * jax.lax.rsqrt(var + eps)
    h = h * ln1_g_ref[0] + ln1_b_ref[0]
    h_lo = h.astype(bf16)                             # MXU operand

    # ---- Q / K / V projections (bf16 operands, f32 accumulation) ----
    q = jnp.dot(h_lo, wq_ref[...], preferred_element_type=jnp.float32) + bq_ref[0]
    k = jnp.dot(h_lo, wk_ref[...], preferred_element_type=jnp.float32) + bk_ref[0]
    v = jnp.dot(h_lo, wv_ref[...], preferred_element_type=jnp.float32) + bv_ref[0]
    q = q.reshape(Bt, S, E)
    k = k.reshape(Bt, S, E)
    v = v.reshape(Bt, S, E)

    # ---- causal scaled dot-product attention (batched over Bt) ----
    scale = 1.0 / math.sqrt(E)
    # contract last dims of q and k directly: no explicit transpose of k
    s = jnp.einsum("bqd,bkd->bqk", q.astype(bf16), k.astype(bf16),
                   preferred_element_type=jnp.float32) * scale       # [Bt,S,S] f32
    row = jax.lax.broadcasted_iota(jnp.int32, (S, S), 0)
    col = jax.lax.broadcasted_iota(jnp.int32, (S, S), 1)
    s = jnp.where(col <= row, s, -jnp.inf)            # causal mask, broadcasts over Bt
    m = jnp.max(s, axis=-1, keepdims=True)
    p = jnp.exp(s - m)
    p = p * pl.reciprocal(jnp.sum(p, axis=-1, keepdims=True), approx=True)
    attn = jnp.einsum("bqk,bkd->bqd", p.astype(bf16), v.astype(bf16),
                      preferred_element_type=jnp.float32)            # [Bt,S,E] f32
    attn = attn.reshape(M, E)

    # ---- output projection + residual (f32) ----
    proj = jnp.dot(attn.astype(bf16), wbp_ref[...],
                   preferred_element_type=jnp.float32) + bbp_ref[0]
    x1 = x + proj

    # ---- LayerNorm 2 (f32, single-pass variance) ----
    mu2 = jnp.mean(x1, axis=-1, keepdims=True)
    var2 = jnp.mean(x1 * x1, axis=-1, keepdims=True) - mu2 * mu2
    h2 = (x1 - mu2) * jax.lax.rsqrt(var2 + eps)
    h2 = h2 * ln2_g_ref[0] + ln2_b_ref[0]

    # ---- feedforward + residual ----
    f1 = jnp.dot(h2.astype(bf16), w1_ref[...],
                 preferred_element_type=jnp.float32) + b1_ref[0]
    f1 = jnp.maximum(f1, 0.0)                         # ReLU in f32
    f2 = jnp.dot(f1.astype(bf16), w2_ref[...],
                 preferred_element_type=jnp.float32) + b2_ref[0]

    o_ref[...] = (x1 + f2).reshape(Bt, S, E)


def _vmem_estimate(Bt, S, E):
    """Resident-VMEM bytes: bf16 weights + f32/bf16 live activation set + scores."""
    H = 4 * E
    f32, bf16 = 4, 2
    M = Bt * S
    weights = (3 * E * E + E * E + E * H + H * E) * bf16   # single-buffered bf16 weights
    vecs = (10 * E + H) * f32                              # biases / LN params (f32)
    io = 2 * 2 * M * E * f32                               # double-buffered x + out
    acts_f32 = 6 * M * E * f32                             # x, proj, x1, attn, f2, temps
    acts_bf16 = 5 * M * E * bf16                           # h, q, k, v, h2 MXU operands
    ffn = M * H * (f32 + bf16)                             # f1 accumulator + bf16 copy
    scores = Bt * S * S * (2 * f32 + bf16)                 # s, p (f32) + bf16 p
    est = weights + vecs + io + acts_f32 + acts_bf16 + ffn + scores
    return int(1.5 * est) + (2 << 20)


def _vmem_budget():
    """Generation-aware VMEM budget with headroom for compiler scratch."""
    cap = 128 << 20
    try:
        cap = pltpu.get_tpu_info().vmem_capacity_bytes
    except Exception:
        pass
    # ~80% of physical: ~51 MiB on v7x (64 MiB/TC), ~102 MiB on v5e/v6e (128 MiB).
    return min(int(cap * 0.8), 110 << 20)


def _choose_bt(B, S, E, budget):
    """Largest Bt dividing B s.t. the block fits VMEM, M=Bt*S <= 512, grid >= 2."""
    valid = []
    for bt in range(1, B + 1):
        if B % bt:
            continue
        steps = B // bt
        if B >= 2 and steps < 2:          # keep both v7x TensorCores busy
            continue
        if bt * S > 512:                  # diminishing MXU returns past M=512
            continue
        if _vmem_estimate(bt, S, E) > budget:
            continue
        valid.append(bt)
    if not valid:
        return 1
    even = [bt for bt in valid if (B // bt) % 2 == 0]
    return max(even) if even else max(valid)


def network_block(x, params):
    """x: [B, S, E] float32. params: dict of weights (already transposed)."""
    B, S, E = x.shape
    H = 4 * E
    budget = _vmem_budget()
    Bt = _choose_bt(B, S, E, budget)
    grid = (B // Bt,)

    # Trace-time split of the fused QKV weight/bias (free; avoids in-kernel
    # lane-slicing of the [M, 3E] projection result), plus bf16 weight copies.
    bf16 = jnp.bfloat16
    wqkv_t = params["wqkv_t"]                    # [E, 3E] f32
    bqkv = params["bqkv"]                        # [1, 3E] f32
    wq_t = wqkv_t[:, :E].astype(bf16)
    wk_t = wqkv_t[:, E:2 * E].astype(bf16)
    wv_t = wqkv_t[:, 2 * E:].astype(bf16)
    bq, bk, bv = bqkv[:, :E], bqkv[:, E:2 * E], bqkv[:, 2 * E:]
    wbp_t = params["wbp_t"].astype(bf16)
    w1_t = params["w1_t"].astype(bf16)
    w2_t = params["w2_t"].astype(bf16)

    def const_spec(shape):
        nd = len(shape)
        # constant operands: index never changes -> single buffer (half the VMEM)
        return pl.BlockSpec(shape, lambda b, _nd=nd: (0,) * _nd,
                            pipeline_mode=pl.Buffered(1))

    in_specs = [
        pl.BlockSpec((Bt, S, E), lambda b: (b, 0, 0)),      # x (double-buffered)
        const_spec((1, E)), const_spec((1, E)),             # ln1 gamma/beta
        const_spec((E, E)), const_spec((E, E)), const_spec((E, E)),   # Wq^T, Wk^T, Wv^T
        const_spec((1, E)), const_spec((1, E)), const_spec((1, E)),   # bq, bk, bv
        const_spec((E, E)), const_spec((1, E)),             # W_bp^T, b_bp
        const_spec((1, E)), const_spec((1, E)),             # ln2 gamma/beta
        const_spec((E, H)), const_spec((1, H)),             # W1^T, b1
        const_spec((H, E)), const_spec((1, E)),             # W2^T, b2
    ]

    vmem_limit = min(max(_vmem_estimate(Bt, S, E), 4 << 20), budget)

    return pl.pallas_call(
        network_block_kernel,
        out_shape=jax.ShapeDtypeStruct((B, S, E), jnp.float32),
        grid_spec=pltpu.PrefetchScalarGridSpec(
            num_scalar_prefetch=0,
            grid=grid,
            in_specs=in_specs,
            out_specs=pl.BlockSpec((Bt, S, E), lambda b: (b, 0, 0)),
        ),
        compiler_params=pltpu.CompilerParams(
            dimension_semantics=("parallel",),
            vmem_limit_bytes=vmem_limit,
        ),
    )(
        x,
        params["ln1_g"], params["ln1_b"],
        wq_t, wk_t, wv_t, bq, bk, bv,
        wbp_t, params["bbp"],
        params["ln2_g"], params["ln2_b"],
        w1_t, params["b1"],
        w2_t, params["b2"],
    )


def init_params(key, E):
    H = 4 * E
    ks = jax.random.split(key, 8)
    scale = 0.02
    return {
        "ln1_g": jnp.ones((1, E), jnp.float32),
        "ln1_b": jnp.zeros((1, E), jnp.float32),
        # nn.Linear(E, 3E).weight is [3E, E]; store transpose [E, 3E]
        "wqkv_t": scale * jax.random.normal(ks[0], (E, 3 * E), jnp.float32),
        "bqkv": scale * jax.random.normal(ks[1], (1, 3 * E), jnp.float32),
        "wbp_t": scale * jax.random.normal(ks[2], (E, E), jnp.float32),
        "bbp": scale * jax.random.normal(ks[3], (1, E), jnp.float32),
        "ln2_g": jnp.ones((1, E), jnp.float32),
        "ln2_b": jnp.zeros((1, E), jnp.float32),
        "w1_t": scale * jax.random.normal(ks[4], (E, H), jnp.float32),
        "b1": scale * jax.random.normal(ks[5], (1, H), jnp.float32),
        "w2_t": scale * jax.random.normal(ks[6], (H, E), jnp.float32),
        "b2": scale * jax.random.normal(ks[7], (1, E), jnp.float32),
    }


def reference_block(x, p):
    """Pure-JAX f32 reference of the same forward pass (for correctness check)."""
    eps = 1e-5
    E = x.shape[-1]

    def ln(h, g, b):
        mu = jnp.mean(h, axis=-1, keepdims=True)
        var = jnp.mean((h - mu) ** 2, axis=-1, keepdims=True)
        return (h - mu) / jnp.sqrt(var + eps) * g + b

    h = ln(x, p["ln1_g"][0], p["ln1_b"][0])
    qkv = h @ p["wqkv_t"] + p["bqkv"][0]
    q, k, v = qkv[..., :E], qkv[..., E:2 * E], qkv[..., 2 * E:]
    s = jnp.einsum("bqe,bke->bqk", q, k) / math.sqrt(E)
    S = x.shape[1]
    mask = jnp.tril(jnp.ones((S, S), bool))
    s = jnp.where(mask, s, -jnp.inf)
    pattn = jax.nn.softmax(s, axis=-1)
    attn = jnp.einsum("bqk,bke->bqe", pattn, v)
    x1 = x + attn @ p["wbp_t"] + p["bbp"][0]
    h2 = ln(x1, p["ln2_g"][0], p["ln2_b"][0])
    ff = jnp.maximum(h2 @ p["w1_t"] + p["b1"][0], 0.0) @ p["w2_t"] + p["b2"][0]
    return x1 + ff


if __name__ == "__main__":
    B, S, E = 2, 8, 32
    key = jax.random.PRNGKey(0)
    kx, kp = jax.random.split(key)
    x = jax.random.normal(kx, (B, S, E), jnp.float32)
    params = init_params(kp, E)

    out = jax.block_until_ready(network_block(x, params))

    ref = reference_block(x, params)
    assert out.shape == (B, S, E)
    # bf16 MXU operands + approx softmax reciprocal -> ~1e-2-level tolerance
    assert jnp.allclose(out, ref, atol=1e-2, rtol=1e-2), "mismatch vs reference"

    print("KERNEL_OK")
</pallas_src>

<mosaic_0001>
module attributes {stable_mosaic.version = 11 : i64} {
  func.func @network_block_kernel(%arg0: i32, %arg1: memref<1x8x32xf32, #tpu.memory_space<vmem>>, %arg2: memref<1x32xf32, #tpu.memory_space<vmem>>, %arg3: memref<1x32xf32, #tpu.memory_space<vmem>>, %arg4: memref<32x32xbf16, #tpu.memory_space<vmem>>, %arg5: memref<32x32xbf16, #tpu.memory_space<vmem>>, %arg6: memref<32x32xbf16, #tpu.memory_space<vmem>>, %arg7: memref<1x32xf32, #tpu.memory_space<vmem>>, %arg8: memref<1x32xf32, #tpu.memory_space<vmem>>, %arg9: memref<1x32xf32, #tpu.memory_space<vmem>>, %arg10: memref<32x32xbf16, #tpu.memory_space<vmem>>, %arg11: memref<1x32xf32, #tpu.memory_space<vmem>>, %arg12: memref<1x32xf32, #tpu.memory_space<vmem>>, %arg13: memref<1x32xf32, #tpu.memory_space<vmem>>, %arg14: memref<32x128xbf16, #tpu.memory_space<vmem>>, %arg15: memref<1x128xf32, #tpu.memory_space<vmem>>, %arg16: memref<128x32xbf16, #tpu.memory_space<vmem>>, %arg17: memref<1x32xf32, #tpu.memory_space<vmem>>, %arg18: memref<1x8x32xf32, #tpu.memory_space<vmem>>) attributes {dimension_semantics = [#tpu.dimension_semantics<parallel>], iteration_bounds = array<i64: 2>, scalar_prefetch = 0 : i64, scratch_operands = 0 : i64, tpu.core_type = #tpu.core_type<tc>, window_params = [{transform_indices = @transform_0, window_bounds = array<i64: 1, 8, 32>}, {pipeline_mode = #tpu.pipeline_mode<synchronous>, transform_indices = @transform_1, window_bounds = array<i64: 1, 32>}, {pipeline_mode = #tpu.pipeline_mode<synchronous>, transform_indices = @transform_2, window_bounds = array<i64: 1, 32>}, {pipeline_mode = #tpu.pipeline_mode<synchronous>, transform_indices = @transform_3, window_bounds = array<i64: 32, 32>}, {pipeline_mode = #tpu.pipeline_mode<synchronous>, transform_indices = @transform_4, window_bounds = array<i64: 32, 32>}, {pipeline_mode = #tpu.pipeline_mode<synchronous>, transform_indices = @transform_5, window_bounds = array<i64: 32, 32>}, {pipeline_mode = #tpu.pipeline_mode<synchronous>, transform_indices = @transform_6, window_bounds = array<i64: 1, 32>}, {pipeline_mode = #tpu.pipeline_mode<synchronous>, transform_indices = @transform_7, window_bounds = array<i64: 1, 32>}, {pipeline_mode = #tpu.pipeline_mode<synchronous>, transform_indices = @transform_8, window_bounds = array<i64: 1, 32>}, {pipeline_mode = #tpu.pipeline_mode<synchronous>, transform_indices = @transform_9, window_bounds = array<i64: 32, 32>}, {pipeline_mode = #tpu.pipeline_mode<synchronous>, transform_indices = @transform_10, window_bounds = array<i64: 1, 32>}, {pipeline_mode = #tpu.pipeline_mode<synchronous>, transform_indices = @transform_11, window_bounds = array<i64: 1, 32>}, {pipeline_mode = #tpu.pipeline_mode<synchronous>, transform_indices = @transform_12, window_bounds = array<i64: 1, 32>}, {pipeline_mode = #tpu.pipeline_mode<synchronous>, transform_indices = @transform_13, window_bounds = array<i64: 32, 128>}, {pipeline_mode = #tpu.pipeline_mode<synchronous>, transform_indices = @transform_14, window_bounds = array<i64: 1, 128>}, {pipeline_mode = #tpu.pipeline_mode<synchronous>, transform_indices = @transform_15, window_bounds = array<i64: 128, 32>}, {pipeline_mode = #tpu.pipeline_mode<synchronous>, transform_indices = @transform_16, window_bounds = array<i64: 1, 32>}, {transform_indices = @transform_17, window_bounds = array<i64: 1, 8, 32>}]} {
    %c0 = arith.constant 0 : index
    %c0_0 = arith.constant 0 : index
    %c0_1 = arith.constant 0 : index
    %0 = vector.load %arg1[%c0, %c0_0, %c0_1] : memref<1x8x32xf32, #tpu.memory_space<vmem>>, vector<1x8x32xf32>
    %1 = vector.shape_cast %0 : vector<1x8x32xf32> to vector<8x32xf32>
    %cst = arith.constant dense<0.000000e+00> : vector<8xf32>
    %2 = vector.multi_reduction <add>, %1, %cst [1] : vector<8x32xf32> to vector<8xf32>
    %3 = vector.shape_cast %2 : vector<8xf32> to vector<8x1xf32>
    %cst_2 = arith.constant 3.200000e+01 : f32
    %4 = vector.broadcast %cst_2 : f32 to vector<8x1xf32>
    %5 = arith.divf %3, %4 : vector<8x1xf32>
    %6 = arith.mulf %1, %1 : vector<8x32xf32>
    %cst_3 = arith.constant dense<0.000000e+00> : vector<8xf32>
    %7 = vector.multi_reduction <add>, %6, %cst_3 [1] : vector<8x32xf32> to vector<8xf32>
    %8 = vector.shape_cast %7 : vector<8xf32> to vector<8x1xf32>
    %cst_4 = arith.constant 3.200000e+01 : f32
    %9 = vector.broadcast %cst_4 : f32 to vector<8x1xf32>
    %10 = arith.divf %8, %9 : vector<8x1xf32>
    %11 = arith.mulf %5, %5 : vector<8x1xf32>
    %12 = arith.subf %10, %11 : vector<8x1xf32>
    %13 = vector.broadcast %5 : vector<8x1xf32> to vector<8x32xf32>
    %14 = arith.subf %1, %13 : vector<8x32xf32>
    %cst_5 = arith.constant 9.99999974E-6 : f32
    %15 = vector.broadcast %cst_5 : f32 to vector<8x1xf32>
    %16 = arith.addf %12, %15 : vector<8x1xf32>
    %17 = math.rsqrt %16 : vector<8x1xf32>
    %18 = vector.broadcast %17 : vector<8x1xf32> to vector<8x32xf32>
    %19 = arith.mulf %14, %18 : vector<8x32xf32>
    %c0_6 = arith.constant 0 : index
    %c0_7 = arith.constant 0 : index
    %20 = vector.load %arg2[%c0_6, %c0_7] : memref<1x32xf32, #tpu.memory_space<vmem>>, vector<1x32xf32>
    %21 = vector.shape_cast %20 : vector<1x32xf32> to vector<32xf32>
    %22 = vector.shape_cast %21 : vector<32xf32> to vector<1x32xf32>
    %23 = vector.broadcast %22 : vector<1x32xf32> to vector<8x32xf32>
    %24 = arith.mulf %19, %23 : vector<8x32xf32>
    %c0_8 = arith.constant 0 : index
    %c0_9 = arith.constant 0 : index
    %25 = vector.load %arg3[%c0_8, %c0_9] : memref<1x32xf32, #tpu.memory_space<vmem>>, vector<1x32xf32>
    %26 = vector.shape_cast %25 : vector<1x32xf32> to vector<32xf32>
    %27 = vector.shape_cast %26 : vector<32xf32> to vector<1x32xf32>
    %28 = vector.broadcast %27 : vector<1x32xf32> to vector<8x32xf32>
    %29 = arith.addf %24, %28 : vector<8x32xf32>
    %30 = arith.truncf %29 : vector<8x32xf32> to vector<8x32xbf16>
    %c0_10 = arith.constant 0 : index
    %c0_11 = arith.constant 0 : index
    %31 = vector.load %arg4[%c0_10, %c0_11] : memref<32x32xbf16, #tpu.memory_space<vmem>>, vector<32x32xbf16>
    %cst_12 = arith.constant dense<0.000000e+00> : vector<8x32xf32>
    %32 = tpu.matmul %30, %31, %cst_12 {dimension_numbers = #tpu.dot_dimension_numbers<[1], [0], [0], [1], [0, 0, 1, 1], [], []>} : vector<8x32xbf16>, vector<32x32xbf16>, vector<8x32xf32> -> vector<8x32xf32>
    %c0_13 = arith.constant 0 : index
    %c0_14 = arith.constant 0 : index
    %33 = vector.load %arg7[%c0_13, %c0_14] : memref<1x32xf32, #tpu.memory_space<vmem>>, vector<1x32xf32>
    %34 = vector.shape_cast %33 : vector<1x32xf32> to vector<32xf32>
    %35 = vector.shape_cast %34 : vector<32xf32> to vector<1x32xf32>
    %36 = vector.broadcast %35 : vector<1x32xf32> to vector<8x32xf32>
    %37 = arith.addf %32, %36 : vector<8x32xf32>
    %c0_15 = arith.constant 0 : index
    %c0_16 = arith.constant 0 : index
    %38 = vector.load %arg5[%c0_15, %c0_16] : memref<32x32xbf16, #tpu.memory_space<vmem>>, vector<32x32xbf16>
    %cst_17 = arith.constant dense<0.000000e+00> : vector<8x32xf32>
    %39 = tpu.matmul %30, %38, %cst_17 {dimension_numbers = #tpu.dot_dimension_numbers<[1], [0], [0], [1], [0, 0, 1, 1], [], []>} : vector<8x32xbf16>, vector<32x32xbf16>, vector<8x32xf32> -> vector<8x32xf32>
    %c0_18 = arith.constant 0 : index
    %c0_19 = arith.constant 0 : index
    %40 = vector.load %arg8[%c0_18, %c0_19] : memref<1x32xf32, #tpu.memory_space<vmem>>, vector<1x32xf32>
    %41 = vector.shape_cast %40 : vector<1x32xf32> to vector<32xf32>
    %42 = vector.shape_cast %41 : vector<32xf32> to vector<1x32xf32>
    %43 = vector.broadcast %42 : vector<1x32xf32> to vector<8x32xf32>
    %44 = arith.addf %39, %43 : vector<8x32xf32>
    %c0_20 = arith.constant 0 : index
    %c0_21 = arith.constant 0 : index
    %45 = vector.load %arg6[%c0_20, %c0_21] : memref<32x32xbf16, #tpu.memory_space<vmem>>, vector<32x32xbf16>
    %cst_22 = arith.constant dense<0.000000e+00> : vector<8x32xf32>
    %46 = tpu.matmul %30, %45, %cst_22 {dimension_numbers = #tpu.dot_dimension_numbers<[1], [0], [0], [1], [0, 0, 1, 1], [], []>} : vector<8x32xbf16>, vector<32x32xbf16>, vector<8x32xf32> -> vector<8x32xf32>
    %c0_23 = arith.constant 0 : index
    %c0_24 = arith.constant 0 : index
    %47 = vector.load %arg9[%c0_23, %c0_24] : memref<1x32xf32, #tpu.memory_space<vmem>>, vector<1x32xf32>
    %48 = vector.shape_cast %47 : vector<1x32xf32> to vector<32xf32>
    %49 = vector.shape_cast %48 : vector<32xf32> to vector<1x32xf32>
    %50 = vector.broadcast %49 : vector<1x32xf32> to vector<8x32xf32>
    %51 = arith.addf %46, %50 : vector<8x32xf32>
    %52 = vector.shape_cast %37 : vector<8x32xf32> to vector<1x8x32xf32>
    %53 = vector.shape_cast %44 : vector<8x32xf32> to vector<1x8x32xf32>
    %54 = vector.shape_cast %51 : vector<8x32xf32> to vector<1x8x32xf32>
    %55 = arith.truncf %52 : vector<1x8x32xf32> to vector<1x8x32xbf16>
    %56 = arith.truncf %53 : vector<1x8x32xf32> to vector<1x8x32xbf16>
    "tpu.trace_start"() <{level = 10 : i32, message = "bqd,bkd->bqk"}> : () -> ()
    %cst_25 = arith.constant dense<0.000000e+00> : vector<1x8x8xf32>
    %57 = tpu.matmul %55, %56, %cst_25 {dimension_numbers = #tpu.dot_dimension_numbers<[2], [2], [1], [1], [0, 0, 0, 1, 1, 1], [0], [0]>} : vector<1x8x32xbf16>, vector<1x8x32xbf16>, vector<1x8x8xf32> -> vector<1x8x8xf32>
    "tpu.trace_stop"() : () -> ()
    %cst_26 = arith.constant 0.176776692 : f32
    %58 = vector.broadcast %cst_26 : f32 to vector<1x8x8xf32>
    %59 = arith.mulf %57, %58 : vector<1x8x8xf32>
    %60 = tpu.iota {dimensions = array<i32: 0>} : vector<8x8xi32>
    %61 = tpu.iota {dimensions = array<i32: 1>} : vector<8x8xi32>
    %62 = arith.cmpi sle, %61, %60 : vector<8x8xi32>
    %cst_27 = arith.constant 0xFF800000 : f32
    %63 = vector.shape_cast %62 : vector<8x8xi1> to vector<1x8x8xi1>
    %64 = vector.broadcast %cst_27 : f32 to vector<1x8x8xf32>
    %65 = arith.select %63, %59, %64 : vector<1x8x8xi1>, vector<1x8x8xf32>
    %cst_28 = arith.constant dense<0xFF800000> : vector<1x8xf32>
    %66 = vector.multi_reduction <maximumf>, %65, %cst_28 [2] : vector<1x8x8xf32> to vector<1x8xf32>
    %67 = vector.shape_cast %66 : vector<1x8xf32> to vector<1x8x1xf32>
    %68 = vector.broadcast %67 : vector<1x8x1xf32> to vector<1x8x8xf32>
    %69 = arith.subf %65, %68 : vector<1x8x8xf32>
    %70 = math.exp %69 : vector<1x8x8xf32>
    %cst_29 = arith.constant dense<0.000000e+00> : vector<1x8xf32>
    %71 = vector.multi_reduction <add>, %70, %cst_29 [2] : vector<1x8x8xf32> to vector<1x8xf32>
    %72 = vector.shape_cast %71 : vector<1x8xf32> to vector<1x8x1xf32>
    %73 = tpu.reciprocal %72 {approx = true} : vector<1x8x1xf32> -> vector<1x8x1xf32>
    %74 = vector.broadcast %73 : vector<1x8x1xf32> to vector<1x8x8xf32>
    %75 = arith.mulf %70, %74 : vector<1x8x8xf32>
    %76 = arith.truncf %75 : vector<1x8x8xf32> to vector<1x8x8xbf16>
    %77 = arith.truncf %54 : vector<1x8x32xf32> to vector<1x8x32xbf16>
    "tpu.trace_start"() <{level = 10 : i32, message = "bqk,bkd->bqd"}> : () -> ()
    %cst_30 = arith.constant dense<0.000000e+00> : vector<1x8x32xf32>
    %78 = tpu.matmul %76, %77, %cst_30 {dimension_numbers = #tpu.dot_dimension_numbers<[2], [1], [1], [2], [0, 0, 0, 1, 1, 2], [0], [0]>} : vector<1x8x8xbf16>, vector<1x8x32xbf16>, vector<1x8x32xf32> -> vector<1x8x32xf32>
    "tpu.trace_stop"() : () -> ()
    %79 = vector.shape_cast %78 : vector<1x8x32xf32> to vector<8x32xf32>
    %80 = arith.truncf %79 : vector<8x32xf32> to vector<8x32xbf16>
    %c0_31 = arith.constant 0 : index
    %c0_32 = arith.constant 0 : index
    %81 = vector.load %arg10[%c0_31, %c0_32] : memref<32x32xbf16, #tpu.memory_space<vmem>>, vector<32x32xbf16>
    %cst_33 = arith.constant dense<0.000000e+00> : vector<8x32xf32>
    %82 = tpu.matmul %80, %81, %cst_33 {dimension_numbers = #tpu.dot_dimension_numbers<[1], [0], [0], [1], [0, 0, 1, 1], [], []>} : vector<8x32xbf16>, vector<32x32xbf16>, vector<8x32xf32> -> vector<8x32xf32>
    %c0_34 = arith.constant 0 : index
    %c0_35 = arith.constant 0 : index
    %83 = vector.load %arg11[%c0_34, %c0_35] : memref<1x32xf32, #tpu.memory_space<vmem>>, vector<1x32xf32>
    %84 = vector.shape_cast %83 : vector<1x32xf32> to vector<32xf32>
    %85 = vector.shape_cast %84 : vector<32xf32> to vector<1x32xf32>
    %86 = vector.broadcast %85 : vector<1x32xf32> to vector<8x32xf32>
    %87 = arith.addf %82, %86 : vector<8x32xf32>
    %88 = arith.addf %1, %87 : vector<8x32xf32>
    %cst_36 = arith.constant dense<0.000000e+00> : vector<8xf32>
    %89 = vector.multi_reduction <add>, %88, %cst_36 [1] : vector<8x32xf32> to vector<8xf32>
    %90 = vector.shape_cast %89 : vector<8xf32> to vector<8x1xf32>
    %cst_37 = arith.constant 3.200000e+01 : f32
    %91 = vector.broadcast %cst_37 : f32 to vector<8x1xf32>
    %92 = arith.divf %90, %91 : vector<8x1xf32>
    %93 = arith.mulf %88, %88 : vector<8x32xf32>
    %cst_38 = arith.constant dense<0.000000e+00> : vector<8xf32>
    %94 = vector.multi_reduction <add>, %93, %cst_38 [1] : vector<8x32xf32> to vector<8xf32>
    %95 = vector.shape_cast %94 : vector<8xf32> to vector<8x1xf32>
    %cst_39 = arith.constant 3.200000e+01 : f32
    %96 = vector.broadcast %cst_39 : f32 to vector<8x1xf32>
    %97 = arith.divf %95, %96 : vector<8x1xf32>
    %98 = arith.mulf %92, %92 : vector<8x1xf32>
    %99 = arith.subf %97, %98 : vector<8x1xf32>
    %100 = vector.broadcast %92 : vector<8x1xf32> to vector<8x32xf32>
    %101 = arith.subf %88, %100 : vector<8x32xf32>
    %cst_40 = arith.constant 9.99999974E-6 : f32
    %102 = vector.broadcast %cst_40 : f32 to vector<8x1xf32>
    %103 = arith.addf %99, %102 : vector<8x1xf32>
    %104 = math.rsqrt %103 : vector<8x1xf32>
    %105 = vector.broadcast %104 : vector<8x1xf32> to vector<8x32xf32>
    %106 = arith.mulf %101, %105 : vector<8x32xf32>
    %c0_41 = arith.constant 0 : index
    %c0_42 = arith.constant 0 : index
    %107 = vector.load %arg12[%c0_41, %c0_42] : memref<1x32xf32, #tpu.memory_space<vmem>>, vector<1x32xf32>
    %108 = vector.shape_cast %107 : vector<1x32xf32> to vector<32xf32>
    %109 = vector.shape_cast %108 : vector<32xf32> to vector<1x32xf32>
    %110 = vector.broadcast %109 : vector<1x32xf32> to vector<8x32xf32>
    %111 = arith.mulf %106, %110 : vector<8x32xf32>
    %c0_43 = arith.constant 0 : index
    %c0_44 = arith.constant 0 : index
    %112 = vector.load %arg13[%c0_43, %c0_44] : memref<1x32xf32, #tpu.memory_space<vmem>>, vector<1x32xf32>
    %113 = vector.shape_cast %112 : vector<1x32xf32> to vector<32xf32>
    %114 = vector.shape_cast %113 : vector<32xf32> to vector<1x32xf32>
    %115 = vector.broadcast %114 : vector<1x32xf32> to vector<8x32xf32>
    %116 = arith.addf %111, %115 : vector<8x32xf32>
    %117 = arith.truncf %116 : vector<8x32xf32> to vector<8x32xbf16>
    %c0_45 = arith.constant 0 : index
    %c0_46 = arith.constant 0 : index
    %118 = vector.load %arg14[%c0_45, %c0_46] : memref<32x128xbf16, #tpu.memory_space<vmem>>, vector<32x128xbf16>
    %cst_47 = arith.constant dense<0.000000e+00> : vector<8x128xf32>
    %119 = tpu.matmul %117, %118, %cst_47 {dimension_numbers = #tpu.dot_dimension_numbers<[1], [0], [0], [1], [0, 0, 1, 1], [], []>} : vector<8x32xbf16>, vector<32x128xbf16>, vector<8x128xf32> -> vector<8x128xf32>
    %c0_48 = arith.constant 0 : index
    %c0_49 = arith.constant 0 : index
    %120 = vector.load %arg15[%c0_48, %c0_49] : memref<1x128xf32, #tpu.memory_space<vmem>>, vector<1x128xf32>
    %121 = vector.shape_cast %120 : vector<1x128xf32> to vector<128xf32>
    %122 = vector.shape_cast %121 : vector<128xf32> to vector<1x128xf32>
    %123 = vector.broadcast %122 : vector<1x128xf32> to vector<8x128xf32>
    %124 = arith.addf %119, %123 : vector<8x128xf32>
    %cst_50 = arith.constant 0.000000e+00 : f32
    %125 = vector.broadcast %cst_50 : f32 to vector<8x128xf32>
    %126 = arith.maximumf %124, %125 : vector<8x128xf32>
    %127 = arith.truncf %126 : vector<8x128xf32> to vector<8x128xbf16>
    %c0_51 = arith.constant 0 : index
    %c0_52 = arith.constant 0 : index
    %128 = vector.load %arg16[%c0_51, %c0_52] : memref<128x32xbf16, #tpu.memory_space<vmem>>, vector<128x32xbf16>
    %cst_53 = arith.constant dense<0.000000e+00> : vector<8x32xf32>
    %129 = tpu.matmul %127, %128, %cst_53 {dimension_numbers = #tpu.dot_dimension_numbers<[1], [0], [0], [1], [0, 0, 1, 1], [], []>} : vector<8x128xbf16>, vector<128x32xbf16>, vector<8x32xf32> -> vector<8x32xf32>
    %c0_54 = arith.constant 0 : index
    %c0_55 = arith.constant 0 : index
    %130 = vector.load %arg17[%c0_54, %c0_55] : memref<1x32xf32, #tpu.memory_space<vmem>>, vector<1x32xf32>
    %131 = vector.shape_cast %130 : vector<1x32xf32> to vector<32xf32>
    %132 = vector.shape_cast %131 : vector<32xf32> to vector<1x32xf32>
    %133 = vector.broadcast %132 : vector<1x32xf32> to vector<8x32xf32>
    %134 = arith.addf %129, %133 : vector<8x32xf32>
    %135 = arith.addf %88, %134 : vector<8x32xf32>
    %136 = vector.shape_cast %135 : vector<8x32xf32> to vector<1x8x32xf32>
    %c0_56 = arith.constant 0 : index
    %c0_57 = arith.constant 0 : index
    %c0_58 = arith.constant 0 : index
    %137 = vector.load %arg18[%c0_56, %c0_57, %c0_58] : memref<1x8x32xf32, #tpu.memory_space<vmem>>, vector<1x8x32xf32>
    tpu.vector_store %arg18[%c0_56, %c0_57, %c0_58], %136 {strides = array<i32>} : memref<1x8x32xf32, #tpu.memory_space<vmem>>, vector<1x8x32xf32>,
    return
  }
  func.func @transform_0(%arg0: i32) -> (i32, i32, i32) {
    %c0_i32 = arith.constant 0 : i32
    %c0_i32_0 = arith.constant 0 : i32
    %c0_i32_1 = arith.constant 0 : i32
    return %arg0, %c0_i32, %c0_i32_0 : i32, i32, i32
  }
  func.func @transform_1(%arg0: i32) -> (i32, i32) {
    %c0_i32 = arith.constant 0 : i32
    %c0_i32_0 = arith.constant 0 : i32
    %c0_i32_1 = arith.constant 0 : i32
    return %c0_i32, %c0_i32_0 : i32, i32
  }
  func.func @transform_2(%arg0: i32) -> (i32, i32) {
    %c0_i32 = arith.constant 0 : i32
    %c0_i32_0 = arith.constant 0 : i32
    %c0_i32_1 = arith.constant 0 : i32
    return %c0_i32, %c0_i32_0 : i32, i32
  }
  func.func @transform_3(%arg0: i32) -> (i32, i32) {
    %c0_i32 = arith.constant 0 : i32
    %c0_i32_0 = arith.constant 0 : i32
    %c0_i32_1 = arith.constant 0 : i32
    return %c0_i32, %c0_i32_0 : i32, i32
  }
  func.func @transform_4(%arg0: i32) -> (i32, i32) {
    %c0_i32 = arith.constant 0 : i32
    %c0_i32_0 = arith.constant 0 : i32
    %c0_i32_1 = arith.constant 0 : i32
    return %c0_i32, %c0_i32_0 : i32, i32
  }
  func.func @transform_5(%arg0: i32) -> (i32, i32) {
    %c0_i32 = arith.constant 0 : i32
    %c0_i32_0 = arith.constant 0 : i32
    %c0_i32_1 = arith.constant 0 : i32
    return %c0_i32, %c0_i32_0 : i32, i32
  }
  func.func @transform_6(%arg0: i32) -> (i32, i32) {
    %c0_i32 = arith.constant 0 : i32
    %c0_i32_0 = arith.constant 0 : i32
    %c0_i32_1 = arith.constant 0 : i32
    return %c0_i32, %c0_i32_0 : i32, i32
  }
  func.func @transform_7(%arg0: i32) -> (i32, i32) {
    %c0_i32 = arith.constant 0 : i32
    %c0_i32_0 = arith.constant 0 : i32
    %c0_i32_1 = arith.constant 0 : i32
    return %c0_i32, %c0_i32_0 : i32, i32
  }
  func.func @transform_8(%arg0: i32) -> (i32, i32) {
    %c0_i32 = arith.constant 0 : i32
    %c0_i32_0 = arith.constant 0 : i32
    %c0_i32_1 = arith.constant 0 : i32
    return %c0_i32, %c0_i32_0 : i32, i32
  }
  func.func @transform_9(%arg0: i32) -> (i32, i32) {
    %c0_i32 = arith.constant 0 : i32
    %c0_i32_0 = arith.constant 0 : i32
    %c0_i32_1 = arith.constant 0 : i32
    return %c0_i32, %c0_i32_0 : i32, i32
  }
  func.func @transform_10(%arg0: i32) -> (i32, i32) {
    %c0_i32 = arith.constant 0 : i32
    %c0_i32_0 = arith.constant 0 : i32
    %c0_i32_1 = arith.constant 0 : i32
    return %c0_i32, %c0_i32_0 : i32, i32
  }
  func.func @transform_11(%arg0: i32) -> (i32, i32) {
    %c0_i32 = arith.constant 0 : i32
    %c0_i32_0 = arith.constant 0 : i32
    %c0_i32_1 = arith.constant 0 : i32
    return %c0_i32, %c0_i32_0 : i32, i32
  }
  func.func @transform_12(%arg0: i32) -> (i32, i32) {
    %c0_i32 = arith.constant 0 : i32
    %c0_i32_0 = arith.constant 0 : i32
    %c0_i32_1 = arith.constant 0 : i32
    return %c0_i32, %c0_i32_0 : i32, i32
  }
  func.func @transform_13(%arg0: i32) -> (i32, i32) {
    %c0_i32 = arith.constant 0 : i32
    %c0_i32_0 = arith.constant 0 : i32
    %c0_i32_1 = arith.constant 0 : i32
    return %c0_i32, %c0_i32_0 : i32, i32
  }
  func.func @transform_14(%arg0: i32) -> (i32, i32) {
    %c0_i32 = arith.constant 0 : i32
    %c0_i32_0 = arith.constant 0 : i32
    %c0_i32_1 = arith.constant 0 : i32
    return %c0_i32, %c0_i32_0 : i32, i32
  }
  func.func @transform_15(%arg0: i32) -> (i32, i32) {
    %c0_i32 = arith.constant 0 : i32
    %c0_i32_0 = arith.constant 0 : i32
    %c0_i32_1 = arith.constant 0 : i32
    return %c0_i32, %c0_i32_0 : i32, i32
  }
  func.func @transform_16(%arg0: i32) -> (i32, i32) {
    %c0_i32 = arith.constant 0 : i32
    %c0_i32_0 = arith.constant 0 : i32
    %c0_i32_1 = arith.constant 0 : i32
    return %c0_i32, %c0_i32_0 : i32, i32
  }
  func.func @transform_17(%arg0: i32) -> (i32, i32, i32) {
    %c0_i32 = arith.constant 0 : i32
    %c0_i32_0 = arith.constant 0 : i32
    %c0_i32_1 = arith.constant 0 : i32
    return %arg0, %c0_i32, %c0_i32_0 : i32, i32, i32
  }
}

</mosaic_0001>

<bundles_post_ra>
// kernel: tpu_custom_call.1
= control target key start
LH: loop header
LB: loop body
LE: loop exit
PB: predicated region body
PF: predicated region fallthrough
CT: control target
= control target key end

     0   :  { %s1717_s0 = inlined_call_operand.vmem [shape: f32[2,8,32], index: 0, kind: input, shape index: {}]   ;;  %s1718_s1 = inlined_call_operand.hbm [shape: f32[1,32], index: 1, kind: input, shape index: {}]   ;;  %s1719_s2 = inlined_call_operand.vmem [shape: f32[1,32], index: 2, kind: input, shape index: {}]   ;;  %s1720_s3 = inlined_call_operand.vmem [shape: bf16[32,32], index: 3, kind: input, shape index: {}]   ;;  %s1721_s4 = inlined_call_operand.vmem [shape: bf16[32,32], index: 4, kind: input, shape index: {}]   ;;  %s1722_s5 = inlined_call_operand.vmem [shape: bf16[32,32], index: 5, kind: input, shape index: {}]   ;;  %s1723_s6 = inlined_call_operand.vmem [shape: f32[1,32], index: 6, kind: input, shape index: {}]   ;;  %s1724_s7 = inlined_call_operand.vmem [shape: f32[1,32], index: 7, kind: input, shape index: {}]   ;;  %s1725_s8 = inlined_call_operand.vmem [shape: f32[1,32], index: 8, kind: input, shape index: {}]   ;;  %s1726_s9 = inlined_call_operand.vmem [shape: bf16[32,32], index: 9, kind: input, shape index: {}]   ;;  %s1727_s10 = inlined_call_operand.vmem [shape: f32[1,32], index: 10, kind: input, shape index: {}]   ;;  %s1728_s11 = inlined_call_operand.vmem [shape: f32[1,32], index: 11, kind: input, shape index: {}]   ;;  %s1729_s12 = inlined_call_operand.vmem [shape: f32[1,32], index: 12, kind: input, shape index: {}]   ;;  %s1730_s13 = inlined_call_operand.hbm [shape: bf16[32,128], index: 13, kind: input, shape index: {}]   ;;  %s1731_s14 = inlined_call_operand.vmem [shape: f32[1,128], index: 14, kind: input, shape index: {}]   ;;  %s1732_s15 = inlined_call_operand.vmem [shape: bf16[128,32], index: 15, kind: input, shape index: {}]   ;;  %s1733_s16 = inlined_call_operand.vmem [shape: f32[1,32], index: 16, kind: input, shape index: {}]   ;;  %s1734_s17 = inlined_call_operand.hbm [shape: f32[2,8,32], index: 17, kind: output, shape index: {}]  }
   0x1   :  { %1741 = sst [smem:[#allocation17_spill]] %s1717_s0 }
   0x2   :  { %1742 = sst [smem:[#allocation18_spill]] %s1718_s1 }
   0x3   :  { %1743 = sst [smem:[#allocation19_spill]] %s1719_s2 }
   0x4   :  { %22 = vsyncpa [#allocation3], 0 }
   0x5   :  { %23 = vsyncpa [#allocation6], 0 }
   0x6   :  { %24 = vsyncpa [#allocation4], 0 }
   0x7   :  { %26 = vsyncpa [#allocation4 + $0x1], 0  ;;  %s1497_s24 = smov 0   ;;  %s1499_s25 = smov 0  }
   0x8   :  { %s1501_s26 = smov 0   ;;  %s1503_s27 = smov 0  }
   0x9 LB: > { %1744 = sst [smem:[#allocation11_spill]] %s1388_s24  ;;  %s1518_s28 = sadd.s32 4294967295, %s1400_s27   ;;  %s1400_s27 = sphi %s1503_s27, %s1759_s27   ;;  %s1396_s26 = sphi %s1501_s26, %s1761_s26   ;;  %s1392_s25 = sphi %s1499_s25, %s1763_s25   ;;  %s1388_s24 = sphi %s1497_s24, %s1762_s24  }
   0xa   : > { %1745 = sst [smem:[#allocation12_spill]] %s1396_s26  ;;  %s1076_s29 = sadd.s32 4294967294, %s1400_s27  }
   0xb   : > { %1746 = sst [smem:[#allocation13_spill]] %s1400_s27  ;;  %s1522_s0 = sadd.s32 1, %s1400_s27  }
   0xc   : > { %1747 = sst [smem:[#allocation14_spill]] %s1522_s0  ;;  %s401_s30 = sadd.s32 1, %s1396_s26 }
   0xd   : > { %s398_s18 = ssub.s32 %s1400_s27, %s1522_s0  ;;  %p411_p0 = scmp.ne.s32.totalorder %s1396_s26, %s1392_s25 }
   0xe   : > { %p399_p1 = scmp.eq.s32.totalorder %s398_s18, 0  ;;  %p412_p2 = scmp.eq.s32.totalorder %s1518_s28, 1 }
   0xf   : > { %p417_p3 = scmp.ne.s32.totalorder %s1392_s25, %s1388_s24  ;;  %p418_p4 = scmp.eq.s32.totalorder %s1076_s29, 1 }
  0x10   : > { %s1533_s19 = scalar_select %p399_p1, %s1396_s26, %s401_s30  }
  0x11   : > { %p1535_p5 = por %p412_p2, %p411_p0  ;;  %p1539_p6 = por %p418_p4, %p417_p3 }
  0x12   : > { %1748 = sst [smem:[#allocation15_spill]] %s1533_s19  ;;  %p1077_p7 = scmp.ge.s32.totalorder %s1400_s27, 1 }
  0x13   : > { %s1750_s20 = scalar_select %p1539_p6, 1, 0 }
  0x14   : > { %p425_p8 = scmp.lt.s32.totalorder %s1400_s27, 3  ;;  %p1208_p9 = scmp.eq.s32.totalorder %s1518_s28, 0 }
  0x15   : > { %1751 = sst [smem:[#allocation16_spill]] %s1750_s20  ;;  %s1402_s18 = smov [#allocation2]  }
  0x16   : > { %p1546_p10 = pnand %p1077_p7, %p425_p8  ;;  %s1753_s29 = sld [smem:[#allocation18_spill]] }
  0x17   : > { %s439_s19 = sshll.u32 %s1402_s18, 4  ;;  %s481_s20 = sshll.u32 %s1730_s13, 4  ;;  %s440_s19 = int_to_ptr.vmem [resolvable:$true] %s439_s19  ;;  %s482_s20 = int_to_ptr.hbm [resolvable:$true] %s481_s20 }
  0x18   : > { %p1197_p11 = pneg %p1546_p10  ;;  %s1403_s24 = smov [#allocation5]  }
  0x19   : > { %s483_s27 = sshll.u32 %s1403_s24, 4  ;;  %s1404_s22 = smov 64   ;;  %s484_s27 = int_to_ptr.vmem [resolvable:$true] %s483_s27 }
  0x1a   : > { %p1198_p12 = pnand %p1208_p9, %p1197_p11  ;;  %s1405_s23 = smov 4  }
  0x1b   : > { %515 = sbr.rel (%p1546_p10) target bundleno = 1422 (0x58e), region = 88 }
  0x1c   : > { %s437_s30 = sshll.u32 %s1753_s29, 4  ;;  %s438_s30 = int_to_ptr.hbm [resolvable:$true] %s437_s30 }
  0x1d   : > { %1200 = dma.hbm_to_vmem [thread:$0]  (!%p1198_p12), %s438_s30, 16, %s440_s19, [#allocation3]  }
  0x1e   : > { %1203 = dma.hbm_to_vmem [thread:$0]  (!%p1198_p12), %s482_s20, 256, %s484_s27, [#allocation6], %s1404_s22, %s1404_s22, %s1405_s23  }
  0x20   : > { %1375 = dma.done.wait (%p1208_p9), [#allocation3], 16  }
  0x21   : > { %1377 = vsyncadd (%p1208_p9), [#allocation3], 4294967280 }
  0x22   : > { %1379 = dma.done.wait (%p1208_p9), [#allocation6], 256  }
  0x23   : > { %1381 = vsyncadd (%p1208_p9), [#allocation6], 4294967040  ;;  %p572_p13 = scmp.lt.s32.totalorder %s1518_s28, 1  ;;  %s1754_s19 = sld [smem:[#allocation17_spill]]  ;;  %vm578_vm0 = vcmask 261120   ;;  %v1406_v4 = vmov 32.0   ;;  %v745_v55 = vlaneseq }
  0x24   : > { %1260 = vrcp.f32 %v1406_v4  ;;  %v1170_v10 = vld [vmem:[%s1720_s3 + $0x8] sm:$0xff]  ;;  %v1169_v14 = vld [vmem:[%s1720_s3] sm:$0xff]  ;;  %s1755_s2 = sld [smem:[#allocation19_spill]]  ;;  %vm768_vm5 = vcmask 1043456   ;;  %vm751_vm7 = vcmask 64512   ;;  %s569_s21 = sand.u32 1, %s1392_s25  }
  0x25   : > { %s573_s24 = scalar_select %p572_p13, %s1518_s28, 1  ;;  %v1172_v11 = vld [vmem:[%s1721_s4 + $0x8] sm:$0xff]  ;;  %650 = vmatpush.bf16.msra.mxu0 %v1170_v10  ;;  %v1171_v15 = vld [vmem:[%s1721_s4] sm:$0xff]  ;;  %v746_v56 = vshrl.u32 %v745_v55, 7  ;;  %v748_v57 = vand.u32 127, %v745_v55 }
  0x26   : > { %v1174_v12 = vld [vmem:[%s1722_s5 + $0x8] sm:$0xff]  ;;  %683 = vmatpush.bf16.msra.mxu1 %v1172_v11  ;;  %v1173_v16 = vld [vmem:[%s1722_s5] sm:$0xff]  ;;  %s1084_s29 = sshll.u32 %s569_s21, 3  ;;  %s1166_s30 = sshll.u32 %s1518_s28, 3 }
  0x27   : > { %s1085_s26 = sshll.u32 %s573_s24, 3  ;;  %716 = vmatpush.bf16.msra.mxu2 %v1174_v12  ;;  %v1250_v31 = vld [vmem:[#allocation2] ss:$0 sm:$0xff]  ;;  %vm749_vm6 = vcmp.le.s32.totalorder %v748_v57, %v746_v56  ;;  %s571_s27 = scalar_lea.vmem [#allocation7], %s1084_s29 }
  0x28   : > { %v1253_v38 = vld [vmem:[%s1724_s7] ss:$0 sm:$0xff]  ;;  %s992_s0 = sshll.u32 %s571_s27, 4  ;;  %s980_s28 = scalar_lea.sflag [#allocation4], %s569_s21  ;;  %s993_s0 = int_to_ptr.vmem [resolvable:$true] %s992_s0 }
  0x29   : > { %s575_s20 = scalar_lea.vmem %s1754_s19, %s1085_s26  ;;  %651 = vmatpush.bf16.msra.mxu0 %v1169_v14  ;;  %v1252_v42 = vld [vmem:[%s1723_s6] ss:$0 sm:$0xff]  ;;  %s990_s26 = scalar_lea.hbm %s1734_s17, %s1166_s30 }
  0x2a   : > { %v1575_v0 = vld [vmem:[%s575_s20] sm:$0xff]  ;;  %v1261_v5 = vpop.eup %1260  ;;  %684 = vmatpush.bf16.msra.mxu1 %v1171_v15  ;;  %s994_s19 = sshll.u32 %s990_s26, 4  ;;  %s1350_s29 = scalar_lea.hbm %s1734_s17, 16  ;;  %s995_s19 = int_to_ptr.hbm [resolvable:$true] %s994_s19 }
  0x2b   : > { %v579_v1 = vsel %vm578_vm0, %v1575_v0, 0.0  ;;  %v590_v2 = vmul.f32 %v1575_v0, %v1575_v0  ;;  %v583_v6 = vmul.f32 32.0, %v1261_v5  ;;  %vm587_vm1 = vweird.f32 %v1261_v5  ;;  %717 = vmatpush.bf16.msra.mxu2 %v1173_v16  ;;  %v1251_v34 = vld [vmem:[%s1755_s2] ss:$0 sm:$0xff]  ;;  %s1344_s20 = sshra.s32 %s995_s19, 4  ;;  %s1345_s20 = int_to_ptr.hbm [resolvable:$true] %s1344_s20 }
  0x2c   : > { %580 = vadd.xlane.f32.xlu0 %v579_v1  ;;  %v1254_v44 = vld [vmem:[%s1725_s8] ss:$0 sm:$0xff]  ;;  %s1346_s18 = scalar_lea.hbm %s1345_s20, 8  ;;  %p1351_p3 = scmp.lt.s32.totalorder %s1345_s20, %s1734_s17 }
  0x2d   : > { %v591_v3 = vsel %vm578_vm0, %v590_v2, 0.0  ;;  %v584_v7 = vsub.f32 1.0, %v583_v6  ;;  %v1175_v6 = vld [vmem:[%s1726_s9] sm:$0xff]  ;;  %p1347_p0 = scmp.ne.s32.totalorder %s1345_s20, %s1346_s18  ;;  %p1352_p4 = scmp.lt.s32.totalorder %s1350_s29, %s1346_s18 }
  0x2e   : > { %v1255_v14 = vld [vmem:[%s1727_s10] ss:$0 sm:$0xff] }
  0x2f   : > { %v585_v8 = vmul.f32 %v1261_v5, %v584_v7  ;;  %p1348_p1 = pnand %p1347_p0, %p1535_p5  ;;  %p1353_p7 = por %p1352_p4, %p1351_p3 }
  0x31   : > { %v586_v9 = vadd.f32 %v1261_v5, %v585_v8  ;;  %p1349_p2 = pneg %p1348_p1 }
  0x33   : > { %v1600_v17 = vsel %vm587_vm1, %v1261_v5, %v586_v9  ;;  %v1176_v5 = vld [vmem:[%s1726_s9 + $0x8] sm:$0xff]  ;;  %p1354_p8 = pnand %p1353_p7, %p1349_p2 }
  0x34   : > { %592 = vadd.xlane.f32.xlu0 %v591_v3  ;;  %815 = vmatpush.bf16.msrb.mxu1 %v1176_v5 }
  0x38   : > { %816 = vmatpush.bf16.msrb.mxu1 %v1175_v6 }
  0x9f   : > { %v581_v13 = vpop.xlane.xlu0 %580 }
  0xa0   : > { %v589_v18 = vmul.f32 %v1600_v17, %v581_v13 }
  0xa2   : > { %v595_v20 = vmul.f32 %v589_v18, %v589_v18  ;;  %v597_v30 = vsub.f32 %v1575_v0, %v589_v18 }
  0xa7   : > { %v593_v19 = vpop.xlane.xlu0 %592 }
  0xa8   : > { %v594_v21 = vmul.f32 %v593_v19, %v1600_v17 }
  0xaa   : > { %v596_v22 = vsub.f32 %v594_v21, %v595_v20 }
  0xac   : > { %v598_v23 = vadd.f32 1e-05, %v596_v22 }
  0xae   : > { %1262 = vrsqrt.f32 %v598_v23  ;;  %vm605_vm3 = vweird.f32 %v598_v23 }
  0xb4   : > { %v1263_v24 = vpop.eup %1262 }
  0xb5   : > { %v600_v25 = vmul.f32 %v1263_v24, %v598_v23  ;;  %vm606_vm2 = vweird.f32 %v1263_v24 }
  0xb6   : > { %vm607_vm4 = vmor %vm605_vm3, %vm606_vm2 }
  0xb7   : > { %v601_v26 = vmul.f32 %v1263_v24, %v600_v25  ;;  %v1177_v25 = vld [vmem:[#allocation5] sm:$0xff] }
  0xb9   : > { %v602_v27 = vmul.f32 0.5, %v601_v26 }
  0xbb   : > { %v603_v28 = vsub.f32 1.5, %v602_v27 }
  0xbd   : > { %v604_v29 = vmul.f32 %v1263_v24, %v603_v28 }
  0xbf   : > { %v608_v32 = vsel %vm607_vm4, %v1263_v24, %v604_v29  ;;  %v1178_v24 = vld [vmem:[#allocation5 + $0x8] sm:$0xff]  ;;  %v1186_v29 = vld [vmem:[%s1732_s15 + $0x38] sm:$0xff] }
  0xc0   : > { %v609_v33 = vmul.f32 %v608_v32, %v597_v30  ;;  %887 = vmatpush.bf16.msrb.mxu2 %v1178_v24 }
  0xc2   : > { %v614_v35 = vmul.f32 %v1250_v31, %v609_v33  ;;  %v1185_v31 = vld [vmem:[%s1732_s15 + $0x30] sm:$0xff]  ;;  %v1184_v33 = vld [vmem:[%s1732_s15 + $0x28] sm:$0xff] }
  0xc4   : > { %v619_v36 = vadd.f32 %v1251_v34, %v614_v35  ;;  %888 = vmatpush.bf16.msrb.mxu2 %v1177_v25 }
  0xc6   : > { %v620_v37 = vpack.c.bf16 %v619_v36, %v619_v36  ;;  %v1182_v36 = vld [vmem:[%s1732_s15 + $0x18] sm:$0xff] }
  0xc8   : > { %1094 = vmatmul.msk.bf16.vlgmr.msra.gmra.mxu0 %vm578_vm0, %v620_v37  ;;  %1103 = vmatmul.msk.bf16.vlgmr.msra.gmra.mxu1 %vm578_vm0, %v620_v37 }
  0xc9   : > { %1112 = vmatmul.msk.bf16.vlgmr.msra.gmra.mxu2 %vm578_vm0, %v620_v37 }
 0x145   : > { %v653_v39 = vpop.f32.mrf.mxu0  ;;  %v686_v40 = vpop.f32.mrf.mxu1 }
 0x146   : > { %v687_v41 = vadd.f32 %v1253_v38, %v686_v40  ;;  %v654_v46 = vadd.f32 %v1252_v42, %v653_v39  ;;  %v1181_v39 = vld [vmem:[%s1732_s15 + $0x10] sm:$0xff] }
 0x148   : > { %v724_v43 = vpack.c.bf16 %v687_v41, %v687_v41  ;;  %v723_v52 = vpack.c.bf16 %v654_v46, %v654_v46  ;;  %v1257_v46 = vld [vmem:[%s1729_s12] ss:$0 sm:$0xff] }
 0x14a   : > { %v729_v45 = vsel %vm578_vm0, %v724_v43, 0  ;;  %v1256_v43 = vld [vmem:[%s1728_s11] ss:$0 sm:$0xff] }
 0x14b   : > { %738 = vmatpush.bf16.xpose.msra.mxu3 %v729_v45 }
 0x14c   : > { %v719_v47 = vpop.f32.mrf.mxu2 }
 0x14d   : > { %v720_v48 = vadd.f32 %v1254_v44, %v719_v47  ;;  %v655_v49 = vpop.f32.mrf.mxu0  ;;  %v688_v50 = vpop.f32.mrf.mxu1 }
 0x14e   : > { %v1180_v50 = vld [vmem:[%s1732_s15 + $0x8] sm:$0xff] }
 0x14f   : > { %v764_v51 = vpack.c.bf16 %v720_v48, %v720_v48 }
 0x151   : > { %v770_v53 = vsel %vm768_vm5, %v764_v51, 0  ;;  %v1179_v51 = vld [vmem:[%s1732_s15] sm:$0xff] }
 0x152   : > { %779 = vmatpush.bf16.msrb.mxu0 %v770_v53  ;;  %1113 = vmatmul.msk.bf16.vlgmr.msra.gmra.mxu3 %vm578_vm0, %v723_v52  ;;  %v1258_v52 = vld [vmem:[%s1731_s14] ss:$0 sm:$0xff] }
 0x153   : > { %964 = vmatpush.bf16.msrb.mxu3 %v1186_v29 }
 0x154   : > { %v721_v54 = vpop.f32.mrf.mxu2 }
 0x157   : > { %965 = vmatpush.bf16.msrb.mxu3 %v1185_v31 }
 0x15b   : > { %966 = vmatpush.bf16.msrb.mxu3 %v1184_v33 }
 0x1d5   : > { %v740_v58 = vpop.f32.mrf.mxu3 }
 0x1d6   : > { %v744_v59 = vmul.f32 0.17677669, %v740_v58  ;;  %v1259_v58 = vld [vmem:[%s1733_s16] ss:$0 sm:$0xff] }
 0x1d8   : > { %v750_v60 = vsel %vm749_vm6, %v744_v59, -inf }
 0x1d9   : > { %v752_v61 = vsel %vm751_vm7, %v750_v60, -inf }
 0x1da   : > { %753 = vmax.xlane.f32.xlu1 %v752_v61 }
 0x1dd   : > { %v742_v62 = vpop.f32.mrf.mxu3 }
 0x24d   : > { %v754_v63 = vpop.xlane.xlu1 %753 }
 0x24e   : > { %v755_v1 = vsub.f32 %v750_v60, %v754_v63 }
 0x250   : > { %v756_v2 = vmul.f32 1.442695, %v755_v1 }
 0x252   : > { %1264 = vpow2.f32 %v756_v2 }
 0x258   : > { %v1265_v3 = vpop.eup %1264 }
 0x259   : > { %v758_v4 = vsel %vm751_vm7, %v1265_v3, 0.0 }
 0x25a   : > { %759 = vadd.xlane.f32.xlu1 %v758_v4 }
 0x2cd   : > { %v760_v7 = vpop.xlane.xlu1 %759 }
 0x2ce   : > { %1266 = vrcp.f32 %v760_v7 }
 0x2d4   : > { %v1267_v8 = vpop.eup %1266 }
 0x2d5   : > { %v762_v9 = vmul.f32 %v1267_v8, %v1265_v3 }
 0x2d7   : > { %v763_v10 = vpack.c.bf16 %v762_v9, %v762_v9 }
 0x2d9   : > { %1114 = vmatmul.msk.bf16.vlgmr.msrb.gmra.mxu0 %vm751_vm7, %v763_v10 }
 0x356   : > { %v781_v11 = vpop.f32.mrf.mxu0 }
 0x357   : > { %v785_v12 = vpack.c.bf16 %v781_v11, %v781_v11 }
 0x359   : > { %1123 = vmatmul.msk.bf16.vlgmr.msrb.gmra.mxu1 %vm578_vm0, %v785_v12 }
 0x35e   : > { %v783_v13 = vpop.f32.mrf.mxu0 }
 0x3d6   : > { %v818_v15 = vpop.f32.mrf.mxu1 }
 0x3d7   : > { %v819_v16 = vadd.f32 %v1255_v14, %v818_v15 }
 0x3d9   : > { %v1636_v18 = vadd.f32 %v819_v16, %v1575_v0 }
 0x3db   : > { %v823_v19 = vsel %vm578_vm0, %v1636_v18, 0.0  ;;  %v827_v21 = vmul.f32 %v1636_v18, %v1636_v18 }
 0x3dc   : > { %824 = vadd.xlane.f32.xlu2 %v823_v19 }
 0x3dd   : > { %v828_v22 = vsel %vm578_vm0, %v827_v21, 0.0 }
 0x3de   : > { %v820_v20 = vpop.f32.mrf.mxu1 }
 0x3e4   : > { %829 = vadd.xlane.f32.xlu2 %v828_v22 }
 0x44f   : > { %v825_v23 = vpop.xlane.xlu2 %824 }
 0x450   : > { %v826_v26 = vmul.f32 %v825_v23, %v1600_v17 }
 0x452   : > { %v832_v27 = vmul.f32 %v826_v26, %v826_v26  ;;  %v834_v42 = vsub.f32 %v1636_v18, %v826_v26 }
 0x457   : > { %v830_v0 = vpop.xlane.xlu2 %829 }
 0x458   : > { %v831_v28 = vmul.f32 %v830_v0, %v1600_v17  ;;  %v1183_v17 = vld [vmem:[%s1732_s15 + $0x20] sm:$0xff] }
 0x459   : > { %967 = vmatpush.bf16.msrb.mxu3 %v1183_v17 }
 0x45a   : > { %v833_v30 = vsub.f32 %v831_v28, %v832_v27 }
 0x45c   : > { %v835_v32 = vadd.f32 1e-05, %v833_v30 }
 0x45d   : > { %968 = vmatpush.bf16.msrb.mxu3 %v1182_v36 }
 0x45e   : > { %1268 = vrsqrt.f32 %v835_v32  ;;  %vm842_vm9 = vweird.f32 %v835_v32 }
 0x461   : > { %969 = vmatpush.bf16.msrb.mxu3 %v1181_v39 }
 0x464   : > { %v1269_v34 = vpop.eup %1268 }
 0x465   : > { %v837_v35 = vmul.f32 %v1269_v34, %v835_v32  ;;  %vm843_vm8 = vweird.f32 %v1269_v34  ;;  %970 = vmatpush.bf16.msrb.mxu3 %v1180_v50 }
 0x466   : > { %vm844_vm10 = vmor %vm842_vm9, %vm843_vm8 }
 0x467   : > { %v838_v37 = vmul.f32 %v1269_v34, %v837_v35 }
 0x469   : > { %v839_v38 = vmul.f32 0.5, %v838_v37  ;;  %971 = vmatpush.bf16.msrb.mxu3 %v1179_v51 }
 0x46b   : > { %v840_v40 = vsub.f32 1.5, %v839_v38 }
 0x46d   : > { %v841_v41 = vmul.f32 %v1269_v34, %v840_v40 }
 0x46f   : > { %v845_v44 = vsel %vm844_vm10, %v1269_v34, %v841_v41 }
 0x470   : > { %v846_v45 = vmul.f32 %v845_v44, %v834_v42 }
 0x472   : > { %v851_v47 = vmul.f32 %v1256_v43, %v846_v45 }
 0x474   : > { %v856_v48 = vadd.f32 %v1257_v46, %v851_v47 }
 0x476   : > { %v857_v49 = vpack.c.bf16 %v856_v48, %v856_v48 }
 0x478   : > { %1132 = vmatmul.msk.bf16.vlgmr.msrb.gmra.mxu2 %vm578_vm0, %v857_v49 }
 0x4fb   : > { %v890_v53 = vpop.f32.mrf.mxu2 }
 0x4fc   : > { %v891_v54 = vadd.f32 %v1258_v52, %v890_v53 }
 0x4fe   : > { %v894_v55 = vmax.f32 %v891_v54, 0.0 }
 0x500   : > { %v895_v56 = vpack.c.bf16 %v894_v55, %v894_v55 }
 0x502   : > { %972 = vmatmul.bf16.vlgmr.msrb.gmra.mxu3 %v895_v56 }
 0x503   : > { %v892_v57 = vpop.f32.mrf.mxu2 }
 0x585   : > { %v973_v59 = vpop.f32.mrf.mxu3 }
 0x586   : > { %v974_v60 = vadd.f32 %v1259_v58, %v973_v59 }
 0x588   : > { %v977_v61 = vadd.f32 %v974_v60, %v1636_v18 }
 0x58a   : > { %978 = vst.msk [vmem:[%s571_s27] sm:$0xff] %vm578_vm0, %v977_v61 }
 0x58b   : > { %1357 = shalt.err (!%p1354_p8)
}
 0x58c   : > { %1195 = dma.vmem_to_hbm [thread:$0]  (%p1535_p5), %s993_s0, 128, %s995_s19, %s980_s28  }
 0x58d   : > { %v975_v62 = vpop.f32.mrf.mxu3 }
 0x58e PF: > { %s1756_s21 = sld [smem:[#allocation13_spill]] }
 0x58f   : > { %s1757_s26 = sld [smem:[#allocation11_spill]] }
 0x594   : > { %p1212_p9 = scmp.ge.s32.totalorder %s1756_s21, 2 }
 0x595   : > { %s1006_s2 = sand.u32 1, %s1757_s26  }
 0x596   : > { %p1205_p10 = pnand %p1212_p9, %p1539_p6  ;;  %s1007_s30 = scalar_lea.sflag [#allocation4], %s1006_s2 }
 0x598   : > { %p1206_p11 = pneg %p1205_p10 }
 0x59a   : > { %1383 = dma.done.wait (%p1206_p11), %s1007_s30, 128  }
 0x59b   : > { %1385 = vsyncadd (%p1206_p11), %s1007_s30, 4294967168  ;;  %s1759_s27 = sld [smem:[#allocation14_spill]]  ;;  %s1762_s24 = smov %s1392_s25 }
 0x59c   : > { %s1760_s20 = sld [smem:[#allocation12_spill]] }
 0x59d   : > { %s1761_s26 = sld [smem:[#allocation15_spill]] }
 0x5a1   : > { %p29_p12 = scmp.ge.s32.totalorder %s1759_s27, 4  }
 0x5a2   : > { %s1763_s25 = smov %s1760_s20 }
 0x5a3   :  { %31 = sbr.rel (!%p29_p12) target bundleno = 9 (0x9), region = 132 }
 0x5a8   :  { %1013 = vsyncpa [#allocation3], 1 }
 0x5a9   :  { %1015 = vsyncpa [#allocation3 + $0x1], 1 }
 0x5aa   :  { %1016 = vsyncpa [#allocation6], 1 }
 0x5ab   :  { %1017 = vsyncpa [#allocation4], 1 }
 0x5ac   :  { %1019 = vsyncpa [#allocation4 + $0x1], 1 }

</bundles_post_ra>
